<compile_context>
chip_gen: v7x
topology: tpu7x:2x2x1
jax: 0.10.0
libtpu: 0.0.40
codegen_flags: <defaults>
</compile_context>

<pallas_src>
import math
import numpy as np

import jax
import jax.numpy as jnp
from jax import lax
from jax.experimental import pallas as pl
from jax.experimental.pallas import tpu as pltpu

_EPS = 1e-12       # matches torch.nn.functional.normalize eps
_CO_PAD = 96       # 84 CRN conv channels zero-padded to a sublane multiple


def _compiler_params():
    return pltpu.CompilerParams(
        dimension_semantics=("parallel",),
        vmem_limit_bytes=64 * 1024 * 1024,  # explicit: default scoped VMEM is small on v5e
    )


def _batch_block(n, cap=4):
    """Largest divisor of n that is <= cap (images processed per grid step)."""
    for b in range(min(cap, n), 0, -1):
        if n % b == 0:
            return b
    return 1


# ---------------------------------------------------------------------------
# Kernel A: channel-wise L2 normalization  (F.normalize(x, p=2, dim=1))
# ---------------------------------------------------------------------------
def l2_normalize_channels(x_flat, bb):
    N, D, S = x_flat.shape

    def kernel(x_ref, o_ref):
        x = x_ref[...]                                      # (bb, D, S)
        ss = jnp.sum(x * x, axis=1, keepdims=True)          # (bb, 1, S)
        # rsqrt * mul  ==  x / max(||x||, eps)   (one EUP op instead of sqrt+div)
        o_ref[...] = x * lax.rsqrt(jnp.maximum(ss, _EPS * _EPS))

    return pl.pallas_call(
        kernel,
        out_shape=jax.ShapeDtypeStruct((N, D, S), x_flat.dtype),
        grid=(N // bb,),
        in_specs=[pl.BlockSpec((bb, D, S), lambda i: (i, 0, 0))],
        out_specs=pl.BlockSpec((bb, D, S), lambda i: (i, 0, 0)),
        compiler_params=_compiler_params(),
    )(x_flat)


# ---------------------------------------------------------------------------
# Kernel B: CRN mask — 7x7 conv accumulated over 49 taps (no HBM im2col),
#           1x1 acc conv, ReLUs, separable bilinear x2 upsample.
# ---------------------------------------------------------------------------
def crn_mask(xp, wc_taps, bc, acc_w, acc_b, uh, uwt, bb):
    """xp: (N, D, Hc+6, Wc+6) bf16 zero-padded pooled map
       wc_taps: (49, Co, D) bf16   per-tap conv weights (tap = dy*7+dx)
       bc, acc_w: (Co, 1) f32      conv bias, acc-conv weights (zero-padded rows)
       acc_b: (1,) f32             acc-conv bias (SMEM scalar)
       uh: (H, Hc), uwt: (Wc, W)   separable bilinear upsample factors
       returns mask (N, 1, H*W) f32 (lane-dense)."""
    N, D, Hp, Wp = xp.shape
    Co = wc_taps.shape[1]
    H, Hc = uh.shape
    Wc, W = uwt.shape
    Sc, S = Hc * Wc, H * W
    assert Hp == Hc + 6 and Wp == Wc + 6

    def kernel(accb_ref, xp_ref, wc_ref, bc_ref, aw_ref, uh_ref, uwt_ref, o_ref):
        bc_v = bc_ref[...]                                   # (Co, 1)
        aw_v = aw_ref[...]                                   # (Co, 1)
        uh_v = uh_ref[...]                                   # (H, Hc)
        uwt_v = uwt_ref[...]                                 # (Wc, W)
        acc_b = accb_ref[0]                                  # scalar (SMEM)
        for b in range(bb):
            # 7x7 conv as 49 tap matmuls, accumulated in f32 (stays in VMEM/vregs)
            g = jnp.zeros((Co, Sc), jnp.float32)
            for dx in range(7):
                # (D, Hp, Wc) window -> flatten (Hp,Wc); dy windows are then
                # contiguous Sc-length slices of the flattened axis.
                cols = xp_ref[b, :, :, dx:dx + Wc].reshape(D, Hp * Wc)
                for dy in range(7):
                    sl = cols[:, dy * Wc:dy * Wc + Sc]        # (D, Sc) bf16
                    g = g + jnp.dot(wc_ref[dy * 7 + dx], sl,
                                    preferred_element_type=jnp.float32)
            g = jnp.maximum(g + bc_v, 0.0)                    # ReLU
            w = jnp.sum(g * aw_v, axis=0, keepdims=True) + acc_b   # acc 1x1 conv
            w = jnp.maximum(w, 0.0)                           # (1, Sc)
            # separable bilinear x2 upsample:  Uh @ w2d @ Uw^T
            w2d = w.reshape(Hc, Wc)
            m2d = jnp.dot(uh_v,
                          jnp.dot(w2d, uwt_v, preferred_element_type=jnp.float32),
                          preferred_element_type=jnp.float32)  # (H, W)
            o_ref[b] = m2d.reshape(1, S)                      # lane-dense store

    return pl.pallas_call(
        kernel,
        out_shape=jax.ShapeDtypeStruct((N, 1, S), jnp.float32),
        grid=(N // bb,),
        in_specs=[
            pl.BlockSpec(memory_space=pltpu.MemorySpace.SMEM),        # acc_b scalar
            pl.BlockSpec((bb, D, Hp, Wp), lambda i: (i, 0, 0, 0)),    # padded pooled map
            pl.BlockSpec((49, Co, D), lambda i: (0, 0, 0)),           # tap weights
            pl.BlockSpec((Co, 1), lambda i: (0, 0)),                  # conv bias
            pl.BlockSpec((Co, 1), lambda i: (0, 0)),                  # acc weights
            pl.BlockSpec((H, Hc), lambda i: (0, 0)),                  # Uh
            pl.BlockSpec((Wc, W), lambda i: (0, 0)),                  # Uw^T
        ],
        out_specs=pl.BlockSpec((bb, 1, S), lambda i: (i, 0, 0)),
        compiler_params=_compiler_params(),
    )(acc_b, xp, wc_taps, bc, acc_w, uh, uwt)


# ---------------------------------------------------------------------------
# Kernel C: masked soft-assignment + VLAD aggregation + normalizations
# ---------------------------------------------------------------------------
def netvlad_aggregate(xn, mask, conv_w, conv_b, centroids, bb):
    N, D, S = xn.shape
    K = conv_w.shape[0]

    def kernel(x_ref, m_ref, aw_ref, ab_ref, c_ref, o_ref):
        aw = aw_ref[...]                                       # (K, D)
        ab = ab_ref[...]                                       # (K, 1)
        cen = c_ref[...]                                       # (K, D)
        for b in range(bb):
            x = x_ref[b]                                       # (D, S)
            logits = jnp.dot(aw, x, preferred_element_type=jnp.float32) + ab
            logits = logits - jnp.max(logits, axis=0, keepdims=True)
            e = jnp.exp(logits)
            a = e * pl.reciprocal(jnp.sum(e, axis=0, keepdims=True), approx=True)
            a = a * m_ref[b]                                   # CRN mask (1, S)
            a_sum = jnp.sum(a, axis=1, keepdims=True)          # (K, 1)
            # contract the S axes directly: no in-kernel transpose of x
            vlad = lax.dot_general(a, x, (((1,), (1,)), ((), ())),
                                   preferred_element_type=jnp.float32)   # (K, D)
            vlad = vlad - cen * a_sum
            rn = jnp.sum(vlad * vlad, axis=1, keepdims=True)
            vlad = vlad * lax.rsqrt(jnp.maximum(rn, _EPS * _EPS))         # intra-norm
            gn = jnp.sum(jnp.sum(vlad * vlad, axis=1, keepdims=True),
                         axis=0, keepdims=True)                           # (1, 1)
            vlad = vlad * lax.rsqrt(jnp.maximum(gn, _EPS * _EPS))         # global L2
            o_ref[b] = vlad.astype(o_ref.dtype)

    return pl.pallas_call(
        kernel,
        out_shape=jax.ShapeDtypeStruct((N, K, D), jnp.float32),
        grid=(N // bb,),
        in_specs=[
            pl.BlockSpec((bb, D, S), lambda i: (i, 0, 0)),
            pl.BlockSpec((bb, 1, S), lambda i: (i, 0, 0)),
            pl.BlockSpec((K, D), lambda i: (0, 0)),
            pl.BlockSpec((K, 1), lambda i: (0, 0)),
            pl.BlockSpec((K, D), lambda i: (0, 0)),
        ],
        out_specs=pl.BlockSpec((bb, K, D), lambda i: (i, 0, 0)),
        compiler_params=_compiler_params(),
    )(xn, mask, conv_w, conv_b, centroids)


# ---------------------------------------------------------------------------
# Wrapper-side layout prep (pure data layout / tiny static matrices)
# ---------------------------------------------------------------------------
def _avg_pool_3x3_s2_ceil(x_img, k=3, s=2):
    """AvgPool2d(kernel=3, stride=2, padding=0, ceil_mode=True) — PyTorch divisors."""
    N, D, H, W = x_img.shape
    Ho = math.ceil((H - k) / s) + 1
    Wo = math.ceil((W - k) / s) + 1
    ph = max(0, (Ho - 1) * s + k - H)
    pw = max(0, (Wo - 1) * s + k - W)
    pad = ((0, 0), (0, 0), (0, ph), (0, pw))
    dims, strides = (1, 1, k, k), (1, 1, s, s)
    zero = jnp.zeros((), x_img.dtype)
    sums = lax.reduce_window(x_img, zero, lax.add, dims, strides, pad)
    cnts = lax.reduce_window(jnp.ones((1, 1, H, W), x_img.dtype), zero,
                             lax.add, dims, strides, pad)
    return sums / cnts


def _combined_conv_weights(params):
    """Embed 3x3/5x5/7x7 filters into one zero-padded 7x7 bank of _CO_PAD channels.
    Returns (per-tap bf16 bank (49,Co,D), flat f32 (Co,D*49) [reference only],
    conv bias (Co,1), acc weights (Co,1))."""
    w3 = jnp.pad(params["w3"], ((0, 0), (0, 0), (2, 2), (2, 2)))
    w5 = jnp.pad(params["w5"], ((0, 0), (0, 0), (1, 1), (1, 1)))
    wc = jnp.concatenate([w3, w5, params["w7"]], axis=0)              # (84, D, 7, 7)
    bc = jnp.concatenate([params["b3"], params["b5"], params["b7"]])  # (84,)
    aw = params["acc_w"]                                              # (84,)
    co, D = wc.shape[0], wc.shape[1]
    pad = _CO_PAD - co
    wc = jnp.pad(wc, ((0, pad), (0, 0), (0, 0), (0, 0)))              # zero rows: exact
    bc = jnp.pad(bc, ((0, pad),))
    aw = jnp.pad(aw, ((0, pad),))
    wc_taps = jnp.transpose(wc, (2, 3, 0, 1)).reshape(49, _CO_PAD, D)
    wc_flat = wc.reshape(_CO_PAD, D * 49)
    return (wc_taps.astype(jnp.bfloat16), wc_flat,
            bc.reshape(_CO_PAD, 1), aw.reshape(_CO_PAD, 1))


def _bilinear_matrix(out_size, in_size):
    """F.interpolate(mode='bilinear', align_corners=False) along one axis."""
    scale = in_size / out_size
    m = np.zeros((out_size, in_size), dtype=np.float32)
    for o in range(out_size):
        src = max((o + 0.5) * scale - 0.5, 0.0)
        i0 = min(int(np.floor(src)), in_size - 1)
        i1 = min(i0 + 1, in_size - 1)
        frac = src - i0
        m[o, i0] += 1.0 - frac
        m[o, i1] += frac
    return m


# ---------------------------------------------------------------------------
# Full CRN forward (Pallas path)
# ---------------------------------------------------------------------------
def crn_forward(x, params, batch_block=4):
    N, D, H, W = x.shape
    S = H * W
    K = params["conv_w"].shape[0]
    bb = _batch_block(N, batch_block)

    # 1) channel-wise L2 normalization (kernel A)
    xn = l2_normalize_channels(x.reshape(N, D, S).astype(jnp.float32), bb)

    # 2) CRN contextual reweighting mask (kernel B)
    pooled = _avg_pool_3x3_s2_ceil(xn.reshape(N, D, H, W))
    Hc, Wc = int(pooled.shape[2]), int(pooled.shape[3])
    assert 2 * Hc == H and 2 * Wc == W, "scale_factor=2 upsample must recover HxW"
    xp = jnp.pad(pooled, ((0, 0), (0, 0), (3, 3), (3, 3))).astype(jnp.bfloat16)
    wc_taps, _, bc, aw = _combined_conv_weights(params)
    uh = jnp.asarray(_bilinear_matrix(H, Hc))          # (H, Hc)
    uwt = jnp.asarray(_bilinear_matrix(W, Wc)).T       # (Wc, W)
    acc_b = params["acc_b"].reshape(1).astype(jnp.float32)
    mask = crn_mask(xp, wc_taps, bc, aw, acc_b, uh, uwt, bb)       # (N, 1, S)

    # 3) masked soft-assignment + VLAD aggregation + norms (kernel C)
    vlad = netvlad_aggregate(xn, mask, params["conv_w"],
                             params["conv_b"].reshape(K, 1),
                             params["centroids"], bb)              # (N, K, D)
    return vlad.reshape(N, K * D)


# ---------------------------------------------------------------------------
# Pure-JAX reference (independent path: im2col + dense kron upsample, f32)
# ---------------------------------------------------------------------------
def _im2col(x, k=7, pad=3):
    N, D, H, W = x.shape
    xp = jnp.pad(x, ((0, 0), (0, 0), (pad, pad), (pad, pad)))
    cols = [xp[:, :, dy:dy + H, dx:dx + W] for dy in range(k) for dx in range(k)]
    p = jnp.stack(cols, axis=2)                        # (N, D, k*k, H, W)
    return p.reshape(N, D * k * k, H * W)


def _upsample_kron(H, W, Hc, Wc):
    return jnp.asarray(np.kron(_bilinear_matrix(H, Hc), _bilinear_matrix(W, Wc)))


def crn_forward_ref(x, params):
    N, D, H, W = x.shape
    S = H * W
    K = params["conv_w"].shape[0]
    hp = "highest"

    xf = x.reshape(N, D, S).astype(jnp.float32)
    nrm = jnp.sqrt(jnp.sum(xf * xf, axis=1, keepdims=True))
    xn = xf / jnp.maximum(nrm, _EPS)

    pooled = _avg_pool_3x3_s2_ceil(xn.reshape(N, D, H, W))
    Hc, Wc = int(pooled.shape[2]), int(pooled.shape[3])
    patches = _im2col(pooled, k=7, pad=3)
    _, wc_flat, bc, aw = _combined_conv_weights(params)
    g = jnp.einsum("oc,ncs->nos", wc_flat, patches, precision=hp) + bc[None]
    g = jnp.maximum(g, 0.0)
    w = jnp.einsum("o,nos->ns", aw[:, 0], g, precision=hp) + params["acc_b"]
    w = jnp.maximum(w, 0.0)
    up = _upsample_kron(H, W, Hc, Wc)                  # (S, Hc*Wc)
    mask = jnp.einsum("sq,nq->ns", up, w, precision=hp)

    logits = jnp.einsum("kd,nds->nks", params["conv_w"], xn, precision=hp)
    logits = logits + params["conv_b"][None, :, None]
    a = jax.nn.softmax(logits, axis=1) * mask[:, None, :]
    a_sum = jnp.sum(a, axis=2)
    vlad = jnp.einsum("nks,nds->nkd", a, xn, precision=hp)
    vlad = vlad - params["centroids"][None] * a_sum[:, :, None]
    vlad = vlad / jnp.maximum(jnp.sqrt(jnp.sum(vlad * vlad, axis=2, keepdims=True)), _EPS)
    vf = vlad.reshape(N, K * D)
    vf = vf / jnp.maximum(jnp.sqrt(jnp.sum(vf * vf, axis=1, keepdims=True)), _EPS)
    return vf


if __name__ == "__main__":
    N, D, K, H, W = 2, 16, 8, 16, 16
    key = jax.random.PRNGKey(0)
    kx, k3, k5, k7, kw, kb, kc = jax.random.split(key, 7)

    def xavier(k, shape):
        fan_in = shape[1] * shape[2] * shape[3]
        fan_out = shape[0] * shape[2] * shape[3]
        std = math.sqrt(2.0 / (fan_in + fan_out))
        return std * jax.random.normal(k, shape, dtype=jnp.float32)

    x = jax.random.normal(kx, (N, D, H, W), dtype=jnp.float32)
    params = dict(
        w3=xavier(k3, (32, D, 3, 3)), b3=jnp.zeros((32,), jnp.float32),
        w5=xavier(k5, (32, D, 5, 5)), b5=jnp.zeros((32,), jnp.float32),
        w7=xavier(k7, (20, D, 7, 7)), b7=jnp.zeros((20,), jnp.float32),
        acc_w=jnp.ones((84,), jnp.float32),      # acc_w conv: weight=1 (frozen)
        acc_b=jnp.zeros((), jnp.float32),        # acc_w conv: bias=0 (frozen)
        conv_w=0.1 * jax.random.normal(kw, (K, D), dtype=jnp.float32),
        conv_b=0.1 * jax.random.normal(kb, (K,), dtype=jnp.float32),
        centroids=jax.random.uniform(kc, (K, D), dtype=jnp.float32),
    )

    out = crn_forward(x, params)
    jax.block_until_ready(out)

    ref = crn_forward_ref(x, params)
    assert out.shape == (N, K * D), out.shape
    assert bool(jnp.all(jnp.isfinite(out)))
    err = float(jnp.max(jnp.abs(out - ref)))
    assert bool(jnp.allclose(out, ref, atol=3e-3, rtol=3e-3)), "max abs err %.3e" % err

    print("KERNEL_OK")
</pallas_src>

<mosaic_0001>
module attributes {stable_mosaic.version = 11 : i64} {
  func.func @kernel(%arg0: i32, %arg1: memref<2x16x256xf32, #tpu.memory_space<vmem>>, %arg2: memref<2x16x256xf32, #tpu.memory_space<vmem>>) attributes {dimension_semantics = [#tpu.dimension_semantics<parallel>], iteration_bounds = array<i64: 1>, scalar_prefetch = 0 : i64, scratch_operands = 0 : i64, tpu.core_type = #tpu.core_type<tc>, window_params = [{transform_indices = @transform_0, window_bounds = array<i64: 2, 16, 256>}, {transform_indices = @transform_1, window_bounds = array<i64: 2, 16, 256>}]} {
    %c0 = arith.constant 0 : index
    %c0_0 = arith.constant 0 : index
    %c0_1 = arith.constant 0 : index
    %0 = vector.load %arg1[%c0, %c0_0, %c0_1] : memref<2x16x256xf32, #tpu.memory_space<vmem>>, vector<2x16x256xf32>
    %1 = arith.mulf %0, %0 : vector<2x16x256xf32>
    %cst = arith.constant dense<0.000000e+00> : vector<2x256xf32>
    %2 = vector.multi_reduction <add>, %1, %cst [1] : vector<2x16x256xf32> to vector<2x256xf32>
    %3 = vector.shape_cast %2 : vector<2x256xf32> to vector<2x1x256xf32>
    %cst_2 = arith.constant 1.000000e-24 : f32
    %4 = vector.broadcast %cst_2 : f32 to vector<2x1x256xf32>
    %5 = arith.maximumf %3, %4 : vector<2x1x256xf32>
    %6 = math.rsqrt %5 : vector<2x1x256xf32>
    %7 = vector.broadcast %6 : vector<2x1x256xf32> to vector<2x16x256xf32>
    %8 = arith.mulf %0, %7 : vector<2x16x256xf32>
    %c0_3 = arith.constant 0 : index
    %c0_4 = arith.constant 0 : index
    %c0_5 = arith.constant 0 : index
    %9 = vector.load %arg2[%c0_3, %c0_4, %c0_5] : memref<2x16x256xf32, #tpu.memory_space<vmem>>, vector<2x16x256xf32>
    tpu.vector_store %arg2[%c0_3, %c0_4, %c0_5], %8 {strides = array<i32>} : memref<2x16x256xf32, #tpu.memory_space<vmem>>, vector<2x16x256xf32>,
    return
  }
  func.func @transform_0(%arg0: i32) -> (i32, i32, i32) {
    %c0_i32 = arith.constant 0 : i32
    %c0_i32_0 = arith.constant 0 : i32
    %c0_i32_1 = arith.constant 0 : i32
    return %arg0, %c0_i32, %c0_i32_0 : i32, i32, i32
  }
  func.func @transform_1(%arg0: i32) -> (i32, i32, i32) {
    %c0_i32 = arith.constant 0 : i32
    %c0_i32_0 = arith.constant 0 : i32
    %c0_i32_1 = arith.constant 0 : i32
    return %arg0, %c0_i32, %c0_i32_0 : i32, i32, i32
  }
}

</mosaic_0001>

<bundles_post_ra>
// kernel: tpu_custom_call.1
= control target key start
LH: loop header
LB: loop body
LE: loop exit
PB: predicated region body
PF: predicated region fallthrough
CT: control target
= control target key end

     0   :  { %6 = vsyncpa [#allocation3], 0  ;;  %s212_s0 = inlined_call_operand.hbm [shape: f32[2,16,256], index: 0, kind: input, shape index: {}]   ;;  %s213_s1 = inlined_call_operand.hbm [shape: f32[2,16,256], index: 1, kind: output, shape index: {}]  }
   0x1   :  { %7 = vsyncpa [#allocation4], 0  ;;  %s168_s6 = smov [#allocation2]   ;;  %s120_s10 = scalar_lea.hbm %s212_s0, 1024 }
   0x2   :  { %s13_s7 = sshll.u32 %s168_s6, 4  ;;  %p121_p0 = scmp.ne.s32.totalorder %s212_s0, %s120_s10  ;;  %s14_s7 = int_to_ptr.vmem [resolvable:$true] %s13_s7 }
   0x3   :  { %p124_p1 = scmp.lt.u32.totalorder %s120_s10, %s212_s0 }
   0x5   :  { %p126_p2 = pnand %p124_p1, %p121_p0 }
   0x7   :  { %129 = shalt.err (!%p126_p2)
}
   0x8   :  { %s130_s15 = scalar_lea.vmem %s14_s7, 1024  ;;  %p135_p4 = scmp.lt.s32.totalorder %s14_s7, %s14_s7 }
   0x9   :  { %p131_p3 = scmp.ne.s32.totalorder %s14_s7, %s130_s15  ;;  %p136_p5 = scmp.lt.s32.totalorder %s130_s15, %s130_s15 }
   0xb   :  { %p137_p6 = por %p136_p5, %p135_p4 }
   0xd   :  { %p138_p7 = pnand %p137_p6, %p131_p3 }
   0xf   :  { %141 = shalt.err (!%p138_p7)
}
  0x10   :  { %s169_s16 = smov 256   ;;  %s170_s17 = smov 16  }
  0x11   :  { %19 = dma.hbm_to_vmem [thread:$0]  %s212_s0, 1024, %s14_s7, [#allocation3], %s169_s16, %s169_s16, %s170_s17  }
  0x12   :  { %164 = dma.done.wait [#allocation3], 1024  }
  0x13   :  { %165 = vsyncadd [#allocation3], 4294966272  ;;  %v23_v0 = vld [vmem:[#allocation2] sm:$0xff]  ;;  %v25_v1 = vld [vmem:[#allocation2 + $0x10] sm:$0xff]  ;;  %s171_s0 = smov [#allocation5]  }
  0x14   :  { %v24_v2 = vld [vmem:[#allocation2 + $0x8] sm:$0xff]  ;;  %v31_v3 = vmul.f32 %v23_v0, %v23_v0  ;;  %v33_v4 = vmul.f32 %v25_v1, %v25_v1  ;;  %v26_v5 = vld [vmem:[#allocation2 + $0x18] sm:$0xff]  ;;  %v27_v7 = vld [vmem:[#allocation2 + $0x20] sm:$0xff]  ;;  %s96_s20 = sshll.u32 %s171_s0, 4  ;;  %s97_s20 = int_to_ptr.vmem [resolvable:$true] %s96_s20 }
  0x15   :  { %v32_v6 = vmul.f32 %v24_v2, %v24_v2  ;;  %v29_v8 = vld [vmem:[#allocation2 + $0x30] sm:$0xff]  ;;  %v34_v9 = vmul.f32 %v26_v5, %v26_v5  ;;  %v35_v10 = vmul.f32 %v27_v7, %v27_v7  ;;  %v28_v12 = vld [vmem:[#allocation2 + $0x28] sm:$0xff]  ;;  %v30_v13 = vld [vmem:[#allocation2 + $0x38] sm:$0xff]  ;;  %s142_s21 = scalar_lea.vmem %s97_s20, 1024  ;;  %p147_p9 = scmp.lt.s32.totalorder %s97_s20, %s97_s20 }
  0x16   :  { %v37_v11 = vmul.f32 %v29_v8, %v29_v8  ;;  %v39_v14 = vadd.f32 %v33_v4, %v31_v3  ;;  %v36_v15 = vmul.f32 %v28_v12, %v28_v12  ;;  %v38_v16 = vmul.f32 %v30_v13, %v30_v13  ;;  %p143_p8 = scmp.ne.s32.totalorder %s97_s20, %s142_s21  ;;  %p148_p10 = scmp.lt.s32.totalorder %s142_s21, %s142_s21 }
  0x17   :  { %v46_v17 = vadd.f32 %v34_v9, %v32_v6 }
  0x18   :  { %v53_v18 = vadd.f32 %v37_v11, %v35_v10  ;;  %v40_v19 = vrot.slane %v39_v14, 4  ;;  %v60_v20 = vadd.f32 %v38_v16, %v36_v15  ;;  %p149_p11 = por %p148_p10, %p147_p9 }
  0x19   :  { %v47_v21 = vrot.slane %v46_v17, 4 }
  0x1a   :  { %v54_v22 = vrot.slane %v53_v18, 4  ;;  %v41_v23 = vadd.f32 %v40_v19, %v39_v14  ;;  %v61_v24 = vrot.slane %v60_v20, 4  ;;  %p150_p12 = pnand %p149_p11, %p143_p8 }
  0x1b   :  { %v48_v25 = vadd.f32 %v47_v21, %v46_v17 }
  0x1c   :  { %v55_v26 = vadd.f32 %v54_v22, %v53_v18  ;;  %v42_v27 = vrot.slane %v41_v23, 2  ;;  %v62_v28 = vadd.f32 %v61_v24, %v60_v20 }
  0x1d   :  { %v49_v29 = vrot.slane %v48_v25, 2 }
  0x1e   :  { %v56_v30 = vrot.slane %v55_v26, 2  ;;  %v43_v31 = vadd.f32 %v42_v27, %v41_v23  ;;  %v63_v32 = vrot.slane %v62_v28, 2 }
  0x1f   :  { %v50_v33 = vadd.f32 %v49_v29, %v48_v25 }
  0x20   :  { %v57_v34 = vadd.f32 %v56_v30, %v55_v26  ;;  %v44_v35 = vrot.slane %v43_v31, 1  ;;  %v64_v36 = vadd.f32 %v63_v32, %v62_v28 }
  0x21   :  { %v51_v37 = vrot.slane %v50_v33, 1 }
  0x22   :  { %v58_v38 = vrot.slane %v57_v34, 1  ;;  %v45_v39 = vadd.f32 %v44_v35, %v43_v31  ;;  %v65_v40 = vrot.slane %v64_v36, 1 }
  0x23   :  { %v52_v41 = vadd.f32 %v51_v37, %v50_v33 }
  0x24   :  { %v59_v42 = vadd.f32 %v58_v38, %v57_v34  ;;  %v67_v43 = vmax.f32 %v45_v39, 1e-24  ;;  %v66_v44 = vadd.f32 %v65_v40, %v64_v36 }
  0x25   :  { %v68_v45 = vmax.f32 %v52_v41, 1e-24 }
  0x26   :  { %v69_v46 = vmax.f32 %v59_v42, 1e-24  ;;  %112 = vrsqrt.f32 %v67_v43  ;;  %v70_v47 = vmax.f32 %v66_v44, 1e-24 }
  0x27   :  { %114 = vrsqrt.f32 %v68_v45 }
  0x28   :  { %116 = vrsqrt.f32 %v69_v46 }
  0x29   :  { %118 = vrsqrt.f32 %v70_v47 }
  0x30   :  { %v113_v48 = vpop.eup %112 }
  0x31   :  { %v115_v49 = vpop.eup %114  ;;  %v75_v50 = vmul.f32 %v113_v48, %v23_v0  ;;  %v77_v51 = vmul.f32 %v113_v48, %v25_v1 }
  0x32   :  { %v117_v52 = vpop.eup %116  ;;  %v76_v53 = vmul.f32 %v115_v49, %v24_v2  ;;  %v78_v54 = vmul.f32 %v115_v49, %v26_v5 }
  0x33   :  { %v119_v55 = vpop.eup %118  ;;  %83 = vst [vmem:[#allocation5] sm:$0xff] %v75_v50  ;;  %85 = vst [vmem:[#allocation5 + $0x10] sm:$0xff] %v77_v51  ;;  %v79_v56 = vmul.f32 %v117_v52, %v27_v7  ;;  %v81_v57 = vmul.f32 %v117_v52, %v29_v8 }
  0x34   :  { %84 = vst [vmem:[#allocation5 + $0x8] sm:$0xff] %v76_v53  ;;  %86 = vst [vmem:[#allocation5 + $0x18] sm:$0xff] %v78_v54  ;;  %v80_v58 = vmul.f32 %v119_v55, %v28_v12  ;;  %v82_v59 = vmul.f32 %v119_v55, %v30_v13 }
  0x35   :  { %87 = vst [vmem:[#allocation5 + $0x20] sm:$0xff] %v79_v56  ;;  %89 = vst [vmem:[#allocation5 + $0x30] sm:$0xff] %v81_v57 }
  0x36   :  { %88 = vst [vmem:[#allocation5 + $0x28] sm:$0xff] %v80_v58  ;;  %90 = vst [vmem:[#allocation5 + $0x38] sm:$0xff] %v82_v59 }
  0x37   :  { %153 = shalt.err (!%p150_p12)
}
  0x38   :  { %s154_s24 = scalar_lea.hbm %s213_s1, 1024 }
  0x39   :  { %p155_p13 = scmp.ne.s32.totalorder %s213_s1, %s154_s24  ;;  %p158_p0 = scmp.lt.u32.totalorder %s154_s24, %s213_s1 }
  0x3b   :  { %p160_p1 = pnand %p158_p0, %p155_p13 }
  0x3d   :  { %163 = shalt.err (!%p160_p1)
}
  0x3e   :  { %102 = dma.vmem_to_hbm [thread:$0]  %s97_s20, 1024, %s213_s1, [#allocation4], %s169_s16, %s169_s16, %s170_s17  }
  0x3f   :  { %166 = dma.done.wait [#allocation4], 1024  }
  0x40   :  { %167 = vsyncadd [#allocation4], 4294966272 }
  0x41   :  { %106 = vsyncpa [#allocation3], 1 }
  0x42   :  { %107 = vsyncpa [#allocation4], 1 }

</bundles_post_ra>
